<compile_context>
chip_gen: v7x
topology: tpu7x:2x2x1
jax: 0.10.0
libtpu: 0.0.40
codegen_flags: <defaults>
</compile_context>

<pallas_src>
import random

import numpy as np
import jax
import jax.numpy as jnp
from jax.experimental import pallas as pl
from jax.experimental.pallas import tpu as pltpu


# ----------------------------------------------------------------------------
# Pallas kernel: the tensor hot path of InfoAggregator.forward
# ----------------------------------------------------------------------------
def info_agg_kernel(emb_ref, w_ref, out_ref):
    emb = emb_ref[...]                                          # [Np, E]

    # rowsum(emb): per-node sum over the feature axis.
    r = jnp.sum(emb, axis=1, keepdims=True)                     # [Np, 1]

    # per_place = W @ rowsum(emb)  (W already folds the 1/(3E), per-group and
    # per-place averaging from the host-side traversal).
    per_place = jnp.dot(w_ref[...], r,
                        preferred_element_type=jnp.float32)     # [Np, 1]

    # F.normalize(final, p=2, dim=0): every column of the reference output is
    # identical, so the per-column L2 norm is one scalar = ||per_place||_2,
    # clamped at eps=1e-12.
    sq = jnp.sum(per_place * per_place, axis=0, keepdims=True)  # [1, 1]
    norm = jnp.maximum(jnp.sqrt(sq), 1e-12)
    col = per_place / norm                                      # [Np, 1]

    # Broadcast the normalized column into the lane-dense padded output.
    out_ref[...] = jnp.broadcast_to(col, out_ref.shape)


def run_info_agg_kernel(emb, W, out_cols):
    n_pad, e = emb.shape
    bytes_io = 4 * (n_pad * e + n_pad * n_pad + n_pad * out_cols)
    vmem_limit = int(min(max(2 * bytes_io + (1 << 20), 4 << 20), 64 << 20))
    return pl.pallas_call(
        info_agg_kernel,
        out_shape=jax.ShapeDtypeStruct((n_pad, out_cols), jnp.float32),
        in_specs=[pl.BlockSpec(memory_space=pltpu.MemorySpace.VMEM)] * 2,
        out_specs=pl.BlockSpec(memory_space=pltpu.MemorySpace.VMEM),
        compiler_params=pltpu.CompilerParams(vmem_limit_bytes=vmem_limit),
        cost_estimate=pl.CostEstimate(
            flops=2 * n_pad * n_pad + n_pad * e + 3 * n_pad * out_cols,
            transcendentals=0,
            bytes_accessed=bytes_io),
    )(emb, W)


# ----------------------------------------------------------------------------
# Host-side graph traversal (mirrors the Python control flow of the PyTorch
# forward exactly) -> a single folded weight matrix W with
#   per_place = W @ rowsum(embeddings).
# ----------------------------------------------------------------------------
# TODO(synk): the dict/list traversal (`nodes.index`, `nextt[...]`,
# `random.shuffle`) is pure Python control flow with no Pallas equivalent;
# it is executed on the host and folded into the dense [N, N] weight matrix.
def build_weight_matrix(variants, nodes, nextt, cat_size):
    n = len(nodes)
    group_rows = []  # list of (place_idx, averaged instance-row)

    for variant in variants:
        activities = variant
        in_variant = {}  # place_idx -> list of instance weight rows
        for ii, activity in enumerate(activities):
            activity_idx = nodes.index(activity)
            next_places = nextt[activity]
            # (faithful to the reference: the list comprehension overwrites the
            #  earlier loop-built selection)
            selected_next_places = [
                np_ for np_ in next_places if nextt[np_] in activities[ii + 1:]
            ]
            for place in selected_next_places:
                place_idx = nodes.index(place)
                next_activities = set(nextt[place])
                next_activities_idx = [nodes.index(a) for a in next_activities]
                if len(next_activities) == 0:
                    continue
                # mean over the 3E-wide concat == (sum(place_f) + sum(src_f)
                # + sum(dst_f)) / (3E); dst_f already carries 1/(cnt+1).
                row = np.zeros(n, np.float64)
                row[place_idx] += 1.0
                row[activity_idx] += 1.0
                for idx in next_activities_idx:
                    row[idx] += 1.0 / (len(next_activities) + 1)
                row /= cat_size
                in_variant.setdefault(place_idx, []).append(row)
        for p_idx, rows in in_variant.items():
            group_rows.append((p_idx, np.mean(np.stack(rows), axis=0)))

    place_counts = {}
    for p_idx, _ in group_rows:
        place_counts[p_idx] = place_counts.get(p_idx, 0) + 1

    W = np.zeros((n, n), np.float64)
    for p_idx, row in group_rows:
        W[p_idx] += row / place_counts[p_idx]
    return W.astype(np.float32)


def info_aggregator_forward(embeddings, variants, nodes, original, edge_index,
                            order, nextt, embedding_size):
    """JAX/Pallas equivalent of InfoAggregator.forward.

    `original`, `edge_index`, `order` are unused by the reference forward.
    The `SecondEncoder` built in __init__ is never invoked in forward, so no
    learned parameters participate.
    """
    del original, edge_index, order
    cat_size = 3 * embedding_size
    variants = list(variants)
    # The reference shuffles in-place; the result is order-independent, so a
    # seeded shuffle keeps determinism without changing semantics.
    random.Random(0).shuffle(variants)

    W = build_weight_matrix(variants, nodes, nextt, cat_size)       # [N, N]

    emb = jnp.asarray(embeddings, jnp.float32)
    n_nodes, e = emb.shape
    n_pad = max(8, ((n_nodes + 7) // 8) * 8)          # sublane-aligned rows
    out_cols = max(128, ((cat_size + 127) // 128) * 128)  # lane-dense output

    emb_p = jnp.zeros((n_pad, e), jnp.float32).at[:n_nodes, :].set(emb)
    W_p = jnp.zeros((n_pad, n_pad), jnp.float32).at[:n_nodes, :n_nodes].set(
        jnp.asarray(W))

    out = run_info_agg_kernel(emb_p, W_p, out_cols)
    return out[:n_nodes, :cat_size]


# ----------------------------------------------------------------------------
# Pure-numpy reference (verbatim port of the PyTorch forward) for checking.
# ----------------------------------------------------------------------------
def reference_forward(emb_np, variants, nodes, nextt, cat_size):
    final = np.zeros((len(nodes), cat_size), np.float32)
    places_temp = {}
    for variant in variants:
        activities = variant
        in_variant = {}
        for ii, activity in enumerate(activities):
            activity_idx = nodes.index(activity)
            next_places = nextt[activity]
            selected = [p for p in next_places if nextt[p] in activities[ii + 1:]]
            for place in selected:
                place_idx = nodes.index(place)
                next_activities = set(nextt[place])
                next_idx = [nodes.index(a) for a in next_activities]
                if len(next_activities) == 0:
                    continue
                src_f = emb_np[activity_idx].copy()
                place_f = emb_np[place_idx]
                dst_f = emb_np[next_idx[0]].copy()
                for l in range(1, len(next_idx)):
                    dst_f = dst_f + emb_np[next_idx[l]]
                dst_f = dst_f / (len(next_activities) + 1)
                cat = np.concatenate([place_f, src_f, dst_f])[None, :]
                in_variant.setdefault(place_idx, []).append(cat)
        for p, e in in_variant.items():
            places_temp.setdefault(p, []).append(np.mean(np.stack(e)))
    for p, e in places_temp.items():
        final[p] += np.mean(np.stack(e))
    norms = np.sqrt((final ** 2).sum(axis=0, keepdims=True))
    return final / np.maximum(norms, 1e-12)


if __name__ == "__main__":
    embedding_size = 32
    # Small synthetic Petri-net-like graph.
    nodes = ["a", "b", "c", "d", "p1", "p2", "p3", "p4"]
    nextt = {
        "a": ["p1", "p4"],
        "b": ["p2"],
        "c": ["p3"],
        "d": [],
        # places map to their (single) next activity, matching the membership
        # test `nextt[place] in activities[ii+1:]` used in the reference.
        "p1": "b",
        "p2": "c",
        "p3": "d",
        "p4": "c",
    }
    variants = [["a", "b", "c", "d"], ["a", "c", "d"]]

    key = jax.random.PRNGKey(0)
    embeddings = jax.random.normal(key, (len(nodes), embedding_size), jnp.float32)

    out = info_aggregator_forward(embeddings, variants, nodes,
                                  original=None, edge_index=None, order=None,
                                  nextt=nextt, embedding_size=embedding_size)
    out = jax.block_until_ready(out)

    expected = reference_forward(np.asarray(embeddings), variants, nodes, nextt,
                                 3 * embedding_size)
    np.testing.assert_allclose(np.asarray(out), expected, rtol=1e-5, atol=1e-5)
    print("KERNEL_OK")
</pallas_src>

<mosaic_0001>
module attributes {stable_mosaic.version = 11 : i64} {
  func.func @info_agg_kernel(%arg0: memref<8x32xf32, #tpu.memory_space<vmem>>, %arg1: memref<8x8xf32, #tpu.memory_space<vmem>>, %arg2: memref<8x128xf32, #tpu.memory_space<vmem>>) attributes {dimension_semantics = [], scalar_prefetch = 0 : i64, scratch_operands = 0 : i64, tpu.core_type = #tpu.core_type<tc>} {
    %c0 = arith.constant 0 : index
    %c0_0 = arith.constant 0 : index
    %0 = vector.load %arg0[%c0, %c0_0] : memref<8x32xf32, #tpu.memory_space<vmem>>, vector<8x32xf32>
    %cst = arith.constant dense<0.000000e+00> : vector<8xf32>
    %1 = vector.multi_reduction <add>, %0, %cst [1] : vector<8x32xf32> to vector<8xf32>
    %2 = vector.shape_cast %1 : vector<8xf32> to vector<8x1xf32>
    %c0_1 = arith.constant 0 : index
    %c0_2 = arith.constant 0 : index
    %3 = vector.load %arg1[%c0_1, %c0_2] : memref<8x8xf32, #tpu.memory_space<vmem>>, vector<8x8xf32>
    %cst_3 = arith.constant dense<0.000000e+00> : vector<8x1xf32>
    %4 = tpu.matmul %3, %2, %cst_3 {dimension_numbers = #tpu.dot_dimension_numbers<[1], [0], [0], [1], [0, 0, 1, 1], [], []>} : vector<8x8xf32>, vector<8x1xf32>, vector<8x1xf32> -> vector<8x1xf32>
    %5 = arith.mulf %4, %4 : vector<8x1xf32>
    %cst_4 = arith.constant dense<0.000000e+00> : vector<1xf32>
    %6 = vector.multi_reduction <add>, %5, %cst_4 [0] : vector<8x1xf32> to vector<1xf32>
    %7 = vector.shape_cast %6 : vector<1xf32> to vector<1x1xf32>
    %8 = math.sqrt %7 : vector<1x1xf32>
    %cst_5 = arith.constant 9.99999996E-13 : f32
    %9 = vector.broadcast %cst_5 : f32 to vector<1x1xf32>
    %10 = arith.maximumf %8, %9 : vector<1x1xf32>
    %11 = vector.broadcast %10 : vector<1x1xf32> to vector<8x1xf32>
    %12 = arith.divf %4, %11 : vector<8x1xf32>
    %13 = vector.shape_cast %12 : vector<8x1xf32> to vector<8x1xf32>
    %14 = vector.broadcast %13 : vector<8x1xf32> to vector<8x128xf32>
    %c0_6 = arith.constant 0 : index
    %c0_7 = arith.constant 0 : index
    %15 = vector.load %arg2[%c0_6, %c0_7] : memref<8x128xf32, #tpu.memory_space<vmem>>, vector<8x128xf32>
    tpu.vector_store %arg2[%c0_6, %c0_7], %14 {strides = array<i32>} : memref<8x128xf32, #tpu.memory_space<vmem>>, vector<8x128xf32>,
    return
  }
}

</mosaic_0001>

<bundles_post_ra>
// kernel: tpu_custom_call.1
= control target key start
LH: loop header
LB: loop body
LE: loop exit
PB: predicated region body
PF: predicated region fallthrough
CT: control target
= control target key end

     0   :  { %7 = vsyncpa [#allocation3], 0  ;;  %s305_s0 = inlined_call_operand.hbm [shape: f32[8,32], index: 0, kind: input, shape index: {}]   ;;  %s306_s1 = inlined_call_operand.hbm [shape: f32[8,8], index: 1, kind: input, shape index: {}]   ;;  %s307_s2 = inlined_call_operand.hbm [shape: f32[8,128], index: 2, kind: output, shape index: {}]  }
   0x1   :  { %8 = vsyncpa [#allocation6], 0 }
   0x2   :  { %9 = vsyncpa [#allocation4], 0  ;;  %s248_s9 = smov [#allocation2]   ;;  %s249_s11 = smov [#allocation5]  }
   0x3   :  { %s16_s10 = sshll.u32 %s248_s9, 4  ;;  %s26_s12 = sshll.u32 %s249_s11, 4  ;;  %s17_s10 = int_to_ptr.vmem [resolvable:$true] %s16_s10  ;;  %s27_s12 = int_to_ptr.vmem [resolvable:$true] %s26_s12 }
   0x4   :  { %s176_s15 = scalar_lea.hbm %s305_s0, 128 }
   0x5   :  { %p177_p0 = scmp.ne.s32.totalorder %s305_s0, %s176_s15  ;;  %p180_p1 = scmp.lt.u32.totalorder %s176_s15, %s305_s0 }
   0x7   :  { %p182_p2 = pnand %p180_p1, %p177_p0 }
   0x9   :  { %185 = shalt.err (!%p182_p2)
}
   0xa   :  { %s186_s20 = scalar_lea.vmem %s17_s10, 128  ;;  %p191_p4 = scmp.lt.s32.totalorder %s17_s10, %s17_s10 }
   0xb   :  { %p187_p3 = scmp.ne.s32.totalorder %s17_s10, %s186_s20  ;;  %p192_p5 = scmp.lt.s32.totalorder %s186_s20, %s186_s20 }
   0xd   :  { %p193_p6 = por %p192_p5, %p191_p4 }
   0xf   :  { %p194_p7 = pnand %p193_p6, %p187_p3 }
  0x11   :  { %197 = shalt.err (!%p194_p7)
}
  0x12   :  { %19 = dma.hbm_to_vmem [thread:$0]  %s305_s0, 128, %s17_s10, [#allocation3]  }
  0x13   :  { %s198_s25 = scalar_lea.hbm %s306_s1, 128 }
  0x14   :  { %p199_p8 = scmp.ne.s32.totalorder %s306_s1, %s198_s25  ;;  %p202_p9 = scmp.lt.u32.totalorder %s198_s25, %s306_s1 }
  0x16   :  { %p204_p10 = pnand %p202_p9, %p199_p8 }
  0x18   :  { %207 = shalt.err (!%p204_p10)
}
  0x19   :  { %s208_s30 = scalar_lea.vmem %s27_s12, 128  ;;  %p213_p12 = scmp.lt.s32.totalorder %s27_s12, %s27_s12 }
  0x1a   :  { %p209_p11 = scmp.ne.s32.totalorder %s27_s12, %s208_s30  ;;  %p214_p13 = scmp.lt.s32.totalorder %s208_s30, %s208_s30 }
  0x1c   :  { %p215_p0 = por %p214_p13, %p213_p12 }
  0x1e   :  { %p216_p1 = pnand %p215_p0, %p209_p11 }
  0x20   :  { %219 = shalt.err (!%p216_p1)
}
  0x21   :  { %29 = dma.hbm_to_vmem [thread:$0]  %s306_s1, 128, %s27_s12, [#allocation6]  }
  0x22   :  { %242 = dma.done.wait [#allocation3], 128  }
  0x23   :  { %243 = vsyncadd [#allocation3], 4294967168 }
  0x24   :  { %244 = dma.done.wait [#allocation6], 128  }
  0x25   :  { %245 = vsyncadd [#allocation6], 4294967168  ;;  %v250_v0 = vmov 0.0   ;;  %vm37_vm0 = vcmask 261120   ;;  %v36_v1 = vld [vmem:[#allocation2] sm:$0xff]  ;;  %vm251_vm1 = vmmov 0  }
  0x26   :  { %160 = vmatprep.subr.mxu0 %v250_v0  ;;  %v38_v2 = vsel %vm37_vm0, %v36_v1, 0.0  ;;  %162 = vmatprep.mubr.msk.f32.mxu0 %vm251_vm1, %v250_v0  ;;  %v41_v3 = vld [vmem:[#allocation5] sm:$0xff]  ;;  %vm42_vm2 = vcmask 64512   ;;  %v252_v5 = vmov 0   ;;  %vm117_vm3 = vcmask 7168   ;;  %s253_s1 = smov [#allocation7]  }
  0x27   :  { %39 = vadd.xlane.f32.xlu0 %v38_v2  ;;  %s147_s4 = sshll.u32 %s253_s1, 4  ;;  %s148_s4 = int_to_ptr.vmem [resolvable:$true] %s147_s4 }
  0x28   :  { %171 = vset.pattern.permute.xlu0 %v252_v5  ;;  %s220_s5 = scalar_lea.vmem %s148_s4, 128  ;;  %p225_p3 = scmp.lt.s32.totalorder %s148_s4, %s148_s4 }
  0x29   :  { %p221_p2 = scmp.ne.s32.totalorder %s148_s4, %s220_s5  ;;  %p226_p4 = scmp.lt.s32.totalorder %s220_s5, %s220_s5 }
  0x2b   :  { %p227_p5 = por %p226_p4, %p225_p3 }
  0x2d   :  { %p228_p6 = pnand %p227_p5, %p221_p2 }
  0xb4   :  { %v40_v4 = vpop.xlane.xlu0 %39 }
  0xb5   :  { %161 = vmatpush3.msra.mxu0 %v40_v4 }
  0xb6   :  { %163 = vmatmul.mubr.msk.f32.vlgmr.msra.gmra.mrb[0].mxu0 %vm42_vm2, %v41_v3 }
 0x189   :  { %v112_v6 = vpop.f32.mrb[0].mxu0 }
 0x18a   :  { %v116_v7 = vmul.f32 %v112_v6, %v112_v6  ;;  %v164_v8 = vpop.f32.mrb[1].mxu0 }
 0x18c   :  { %v118_v9 = vsel %vm117_vm3, %v116_v7, 0.0 }
 0x18d   :  { %v119_v10 = vrot.slane %v118_v9, 4 }
 0x18f   :  { %v120_v11 = vadd.f32 %v119_v10, %v118_v9 }
 0x191   :  { %v121_v12 = vrot.slane %v120_v11, 2 }
 0x193   :  { %v122_v13 = vadd.f32 %v121_v12, %v120_v11 }
 0x195   :  { %v123_v14 = vrot.slane %v122_v13, 1 }
 0x197   :  { %v124_v15 = vadd.f32 %v123_v14, %v122_v13 }
 0x199   :  { %172 = vrsqrt.f32 %v124_v15  ;;  %vm127_vm4 = vcmp.eq.f32.partialorder %v124_v15, inf  ;;  %v130_v18 = vand.u32 2147483648, %v124_v15  ;;  %vm129_vm5 = vcmp.eq.f32.partialorder %v124_v15, 0.0 }
 0x1a3   :  { %v173_v16 = vpop.eup %172 }
 0x1a4   :  { %v126_v17 = vmul.f32 %v173_v16, %v124_v15 }
 0x1a6   :  { %v128_v19 = vsel %vm127_vm4, %v124_v15, %v126_v17 }
 0x1a7   :  { %v131_v20 = vsel %vm129_vm5, %v130_v18, %v128_v19 }
 0x1a8   :  { %v132_v21 = vmax.f32 %v131_v20, 1e-12 }
 0x1aa   :  { %174 = vrcp.f32 %v132_v21 }
 0x1b4   :  { %v175_v22 = vpop.eup %174 }
 0x1b5   :  { %v134_v23 = vmul.f32 %v175_v22, %v112_v6 }
 0x1b7   :  { %137 = vperm.xlu0 %171, %v134_v23  }
 0x236   :  { %v138_v24 = vpop.permute.xlu0 %137 }
 0x237   :  { %140 = vst [vmem:[#allocation7] sm:$0xff] %v138_v24 }
 0x238   :  { %231 = shalt.err (!%p228_p6)
}
 0x239   :  { %s232_s8 = scalar_lea.hbm %s307_s2, 128 }
 0x23a   :  { %p233_p7 = scmp.ne.s32.totalorder %s307_s2, %s232_s8  ;;  %p236_p8 = scmp.lt.u32.totalorder %s232_s8, %s307_s2 }
 0x23c   :  { %p238_p9 = pnand %p236_p8, %p233_p7 }
 0x23e   :  { %241 = shalt.err (!%p238_p9)
}
 0x23f   :  { %150 = dma.vmem_to_hbm [thread:$0]  %s148_s4, 128, %s307_s2, [#allocation4]  }
 0x240   :  { %246 = dma.done.wait [#allocation4], 128  }
 0x241   :  { %247 = vsyncadd [#allocation4], 4294967168 }
 0x242   :  { %154 = vsyncpa [#allocation3], 1 }
 0x243   :  { %155 = vsyncpa [#allocation6], 1 }
 0x244   :  { %156 = vsyncpa [#allocation4], 1 }

</bundles_post_ra>
